<compile_context>
chip_gen: v5e
topology: v5e:2x2
jax: 0.10.0
libtpu: 0.0.40
codegen_flags: <defaults>
</compile_context>

<pallas_src>
import functools

import jax
import jax.numpy as jnp
from jax.experimental import pallas as pl
from jax.experimental.pallas import tpu as pltpu


def _round_up(a, m):
    return (a + m - 1) // m * m


def _ceil_div(a, b):
    return -(-a // b)


# ----------------------------------------------------------------------------
# Kernel: 6 fused Linear layers (ReLU x5, Sigmoid on the last).
#   xf_ref : (TM, xc_al)     input dtype   (flattened x rows, lane-padded)
#   yf_ref : (TM, yc_al)     input dtype   (flattened y rows, lane-padded)
#   w_ref  : (6, D, D)       bf16, zero-padded weight stack, (in, out) layout
#   b_ref  : (8, D)          f32, zero-padded bias pack (row j = layer j)
#   out_ref: (TM, out_dim)   input dtype   (exactly n*k lanes, no padding)
# ----------------------------------------------------------------------------
def _encdec_kernel(xf_ref, yf_ref, w_ref, b_ref, out_ref, *, xc_al, yc_al, out_dim):
    b = b_ref[...]                                   # (8, D) f32, VMEM-resident

    # ---- layer 0: Linear(input_size, hidden1) + ReLU, concat folded in ----
    # xc_al / yc_al are multiples of 16, so both K-slices of the bf16 weight
    # stay aligned to the packed (16, 128) sublane tile (no relayout copies).
    w0 = w_ref[0]                                    # (D, D) bf16
    z0 = jnp.dot(xf_ref[...].astype(jnp.bfloat16), w0[:xc_al, :],
                 preferred_element_type=jnp.float32)
    z0 = z0 + jnp.dot(yf_ref[...].astype(jnp.bfloat16),
                      w0[xc_al:xc_al + yc_al, :],
                      preferred_element_type=jnp.float32)
    h = jnp.maximum(z0 + b[0:1, :], 0.0)

    def dense(h, j):
        return jnp.dot(h.astype(jnp.bfloat16), w_ref[j],
                       preferred_element_type=jnp.float32) + b[j:j + 1, :]

    # ---- remaining encoder / decoder layers ----
    h = jnp.maximum(dense(h, 1), 0.0)                # Linear(hidden1, 32) + ReLU
    h = jnp.maximum(dense(h, 2), 0.0)                # Linear(32, hidden2) + ReLU
    h = jnp.maximum(dense(h, 3), 0.0)                # Linear(hidden2, hidden1) + ReLU
    h = jnp.maximum(dense(h, 4), 0.0)                # Linear(hidden1, 32) + ReLU
    h = jax.nn.sigmoid(dense(h, 5))                  # Linear(32, input_size) + Sigmoid

    # Store only the real n*k lanes -> output HBM traffic is exactly what the
    # consumer needs (no padded slab, no XLA re-slice afterwards).
    out_ref[...] = h[:, :out_dim].astype(out_ref.dtype)


# ----------------------------------------------------------------------------
# One-time parameter packing (call OUTSIDE the jitted forward).
# ----------------------------------------------------------------------------
def pack_params(params, xc):
    """Stack & zero-pad the 6 (W, b) pairs into one bf16 weight stack and one
    f32 bias pack.  Layer 0's weight rows are split at `xc`; the y-half is
    placed at a 16-row-aligned offset so in-kernel bf16 slices stay tile
    aligned."""
    n_layers = len(params)
    input_size = params[0][0].shape[0]
    yc = input_size - xc
    xc_al = _round_up(xc, 16)
    yc_al = _round_up(yc, 16)
    max_dim = max(max(w.shape) for (w, _) in params)
    d_pad = _round_up(max(max_dim, xc_al + yc_al), 128)

    wstack = jnp.zeros((n_layers, d_pad, d_pad), jnp.bfloat16)
    bpack = jnp.zeros((_round_up(n_layers, 8), d_pad), jnp.float32)
    for j, (w, bias) in enumerate(params):
        wj = w.astype(jnp.bfloat16)
        fi, fo = w.shape
        if j == 0:
            wstack = wstack.at[0, :xc, :fo].set(wj[:xc])
            wstack = wstack.at[0, xc_al:xc_al + yc, :fo].set(wj[xc:])
        else:
            wstack = wstack.at[j, :fi, :fo].set(wj)
        bpack = bpack.at[j, :fo].set(bias.reshape(-1).astype(jnp.float32))
    return wstack, bpack


# ----------------------------------------------------------------------------
# Forward (jitted): mirrors Encoder_Decoder.forward(x, y).
# ----------------------------------------------------------------------------
@jax.jit
def encoder_decoder_forward(x, y, wstack, bpack):
    B = x.shape[0]
    n = x.shape[1] + y.shape[1]                      # torch.cat((x, y), dim=1)
    k = x.shape[2]
    xc = x.shape[1] * x.shape[2]
    yc = y.shape[1] * y.shape[2]
    xc_al = _round_up(xc, 16)
    yc_al = _round_up(yc, 16)
    out_dim = n * k                                  # == input_size of the model
    d_pad = wstack.shape[1]

    # Flatten per-sample rows; the concat itself happens inside the kernel.
    xf = x.reshape(B, xc)
    yf = y.reshape(B, yc)
    if xc_al != xc:
        xf = jnp.pad(xf, ((0, 0), (0, xc_al - xc)))
    if yc_al != yc:
        yf = jnp.pad(yf, ((0, 0), (0, yc_al - yc)))

    # Row tile: large (up to 2048 rows) to amortize the ~0.35 us per-step
    # pipeline overhead, scaled down if d_pad grows so activations stay within
    # a few MiB of VMEM; tiles are balanced so batch padding stays < 1 tile.
    row_mult = 16 if x.dtype == jnp.bfloat16 else 8
    tm_cap = max(256, min(2048, (2 * 1024 * 1024) // (d_pad * 4)))
    tm_cap = max(row_mult, (tm_cap // row_mult) * row_mult)
    n_tiles = _ceil_div(B, tm_cap)
    tm = _round_up(_ceil_div(B, n_tiles), row_mult)
    b_pad = _round_up(B, tm)
    if b_pad != B:
        xf = jnp.pad(xf, ((0, b_pad - B), (0, 0)))
        yf = jnp.pad(yf, ((0, b_pad - B), (0, 0)))

    kernel = functools.partial(_encdec_kernel, xc_al=xc_al, yc_al=yc_al,
                               out_dim=out_dim)

    out = pl.pallas_call(
        kernel,
        out_shape=jax.ShapeDtypeStruct((b_pad, out_dim), x.dtype),
        grid=(b_pad // tm,),
        in_specs=[
            pl.BlockSpec((tm, xc_al), lambda i: (i, 0)),        # x rows (tiled)
            pl.BlockSpec((tm, yc_al), lambda i: (i, 0)),        # y rows (tiled)
            pl.BlockSpec(wstack.shape, lambda i: (0, 0, 0)),    # weights, resident
            pl.BlockSpec(bpack.shape, lambda i: (0, 0)),        # biases, resident
        ],
        out_specs=pl.BlockSpec((tm, out_dim), lambda i: (i, 0)),
        compiler_params=pltpu.CompilerParams(
            dimension_semantics=("parallel",),
            vmem_limit_bytes=32 * 1024 * 1024,
        ),
    )(xf, yf, wstack, bpack)

    if b_pad != B:
        out = out[:B]
    return out.reshape(-1, n, k)                     # decoded.reshape(-1, n, k)


# ----------------------------------------------------------------------------
# Deterministic parameter init (PyTorch nn.Linear-style uniform(-1/sqrt(fan_in)))
# Weights stored as (in_features, out_features) so each layer is x @ W + b.
# ----------------------------------------------------------------------------
def init_params(key, window_size, n_feats, hidden1, hidden2):
    input_size = window_size * n_feats
    layer_dims = [
        (input_size, hidden1),   # encoder L1
        (hidden1, 32),           # encoder L2
        (32, hidden2),           # encoder L3
        (hidden2, hidden1),      # decoder L1
        (hidden1, 32),           # decoder L2
        (32, input_size),        # decoder L3
    ]
    params = []
    for (fan_in, fan_out) in layer_dims:
        key, kw, kb = jax.random.split(key, 3)
        bound = 1.0 / jnp.sqrt(jnp.float32(fan_in))
        w = jax.random.uniform(kw, (fan_in, fan_out), jnp.float32, -bound, bound)
        b = jax.random.uniform(kb, (1, fan_out), jnp.float32, -bound, bound)
        params.append((w, b))
    return params


# ----------------------------------------------------------------------------
# Pure-JAX f32 reference (for sanity check against the kernel)
# ----------------------------------------------------------------------------
def reference_forward(x, y, params):
    inp = jnp.concatenate((x, y), axis=1)
    n, k = inp.shape[1], inp.shape[2]
    h = inp.reshape(-1, n * k)
    acts = [jax.nn.relu] * 5 + [jax.nn.sigmoid]
    for (w, b), act in zip(params, acts):
        h = act(h @ w + b)
    return h.reshape(-1, n, k)


if __name__ == "__main__":
    # window_size=8, n_feats=4 -> input_size = 32
    # x: (2, 4, 4), y: (2, 4, 4) -> cat dim=1 -> (2, 8, 4), n*k = 32
    window_size, n_feats = 8, 4
    hidden1, hidden2 = 32, 16
    batch = 2

    key = jax.random.PRNGKey(0)
    key, kx, ky, kp = jax.random.split(key, 4)
    x = jax.random.normal(kx, (batch, 4, 4), jnp.float32)
    y = jax.random.normal(ky, (batch, 4, 4), jnp.float32)
    params = init_params(kp, window_size, n_feats, hidden1, hidden2)

    # Pack weights/biases ONCE (outside the jitted per-call path).
    xc = x.shape[1] * x.shape[2]
    wstack, bpack = pack_params(params, xc)

    out = encoder_decoder_forward(x, y, wstack, bpack)
    out = jax.block_until_ready(out)

    ref = reference_forward(x, y, params)
    assert out.shape == (batch, 8, 4), out.shape
    # bf16 matmuls vs f32 reference -> loose-ish tolerance on the sigmoid output
    assert jnp.allclose(out, ref, atol=2e-2, rtol=2e-2), "mismatch vs reference"

    print("KERNEL_OK")
</pallas_src>

<mosaic_0001>
module attributes {stable_mosaic.version = 11 : i64} {
  func.func @_encdec_kernel(%arg0: i32, %arg1: memref<8x16xf32, #tpu.memory_space<vmem>>, %arg2: memref<8x16xf32, #tpu.memory_space<vmem>>, %arg3: memref<6x128x128xbf16, #tpu.memory_space<vmem>>, %arg4: memref<8x128xf32, #tpu.memory_space<vmem>>, %arg5: memref<8x32xf32, #tpu.memory_space<vmem>>) attributes {dimension_semantics = [#tpu.dimension_semantics<parallel>], iteration_bounds = array<i64: 1>, scalar_prefetch = 0 : i64, scratch_operands = 0 : i64, tpu.core_type = #tpu.core_type<tc>, window_params = [{transform_indices = @transform_0, window_bounds = array<i64: 8, 16>}, {transform_indices = @transform_1, window_bounds = array<i64: 8, 16>}, {pipeline_mode = #tpu.pipeline_mode<synchronous>, transform_indices = @transform_2, window_bounds = array<i64: 6, 128, 128>}, {pipeline_mode = #tpu.pipeline_mode<synchronous>, transform_indices = @transform_3, window_bounds = array<i64: 8, 128>}, {transform_indices = @transform_4, window_bounds = array<i64: 8, 32>}]} {
    %c0 = arith.constant 0 : index
    %c0_0 = arith.constant 0 : index
    %0 = vector.load %arg4[%c0, %c0_0] : memref<8x128xf32, #tpu.memory_space<vmem>>, vector<8x128xf32>
    %c0_1 = arith.constant 0 : index
    %c0_2 = arith.constant 0 : index
    %c0_3 = arith.constant 0 : index
    %1 = vector.load %arg3[%c0_1, %c0_2, %c0_3] : memref<6x128x128xbf16, #tpu.memory_space<vmem>>, vector<1x128x128xbf16>
    %2 = vector.shape_cast %1 : vector<1x128x128xbf16> to vector<128x128xbf16>
    %c0_4 = arith.constant 0 : index
    %c0_5 = arith.constant 0 : index
    %3 = vector.load %arg1[%c0_4, %c0_5] : memref<8x16xf32, #tpu.memory_space<vmem>>, vector<8x16xf32>
    %4 = arith.truncf %3 : vector<8x16xf32> to vector<8x16xbf16>
    %5 = vector.extract_strided_slice %2 {offsets = [0, 0], sizes = [16, 128], strides = [1, 1]} : vector<128x128xbf16> to vector<16x128xbf16>
    %cst = arith.constant dense<0.000000e+00> : vector<8x128xf32>
    %6 = tpu.matmul %4, %5, %cst {dimension_numbers = #tpu.dot_dimension_numbers<[1], [0], [0], [1], [0, 0, 1, 1], [], []>} : vector<8x16xbf16>, vector<16x128xbf16>, vector<8x128xf32> -> vector<8x128xf32>
    %c0_6 = arith.constant 0 : index
    %c0_7 = arith.constant 0 : index
    %7 = vector.load %arg2[%c0_6, %c0_7] : memref<8x16xf32, #tpu.memory_space<vmem>>, vector<8x16xf32>
    %8 = arith.truncf %7 : vector<8x16xf32> to vector<8x16xbf16>
    %9 = vector.extract_strided_slice %2 {offsets = [16, 0], sizes = [16, 128], strides = [1, 1]} : vector<128x128xbf16> to vector<16x128xbf16>
    %cst_8 = arith.constant dense<0.000000e+00> : vector<8x128xf32>
    %10 = tpu.matmul %8, %9, %cst_8 {dimension_numbers = #tpu.dot_dimension_numbers<[1], [0], [0], [1], [0, 0, 1, 1], [], []>} : vector<8x16xbf16>, vector<16x128xbf16>, vector<8x128xf32> -> vector<8x128xf32>
    %11 = arith.addf %6, %10 : vector<8x128xf32>
    %12 = vector.extract_strided_slice %0 {offsets = [0, 0], sizes = [1, 128], strides = [1, 1]} : vector<8x128xf32> to vector<1x128xf32>
    %13 = vector.broadcast %12 : vector<1x128xf32> to vector<8x128xf32>
    %14 = arith.addf %11, %13 : vector<8x128xf32>
    %cst_9 = arith.constant 0.000000e+00 : f32
    %15 = vector.broadcast %cst_9 : f32 to vector<8x128xf32>
    %16 = arith.maximumf %14, %15 : vector<8x128xf32>
    %17 = arith.truncf %16 : vector<8x128xf32> to vector<8x128xbf16>
    %c1 = arith.constant 1 : index
    %c0_10 = arith.constant 0 : index
    %c0_11 = arith.constant 0 : index
    %18 = vector.load %arg3[%c1, %c0_10, %c0_11] : memref<6x128x128xbf16, #tpu.memory_space<vmem>>, vector<1x128x128xbf16>
    %19 = vector.shape_cast %18 : vector<1x128x128xbf16> to vector<128x128xbf16>
    %cst_12 = arith.constant dense<0.000000e+00> : vector<8x128xf32>
    %20 = tpu.matmul %17, %19, %cst_12 {dimension_numbers = #tpu.dot_dimension_numbers<[1], [0], [0], [1], [0, 0, 1, 1], [], []>} : vector<8x128xbf16>, vector<128x128xbf16>, vector<8x128xf32> -> vector<8x128xf32>
    %21 = vector.extract_strided_slice %0 {offsets = [1, 0], sizes = [1, 128], strides = [1, 1]} : vector<8x128xf32> to vector<1x128xf32>
    %22 = vector.broadcast %21 : vector<1x128xf32> to vector<8x128xf32>
    %23 = arith.addf %20, %22 : vector<8x128xf32>
    %cst_13 = arith.constant 0.000000e+00 : f32
    %24 = vector.broadcast %cst_13 : f32 to vector<8x128xf32>
    %25 = arith.maximumf %23, %24 : vector<8x128xf32>
    %26 = arith.truncf %25 : vector<8x128xf32> to vector<8x128xbf16>
    %c2 = arith.constant 2 : index
    %c0_14 = arith.constant 0 : index
    %c0_15 = arith.constant 0 : index
    %27 = vector.load %arg3[%c2, %c0_14, %c0_15] : memref<6x128x128xbf16, #tpu.memory_space<vmem>>, vector<1x128x128xbf16>
    %28 = vector.shape_cast %27 : vector<1x128x128xbf16> to vector<128x128xbf16>
    %cst_16 = arith.constant dense<0.000000e+00> : vector<8x128xf32>
    %29 = tpu.matmul %26, %28, %cst_16 {dimension_numbers = #tpu.dot_dimension_numbers<[1], [0], [0], [1], [0, 0, 1, 1], [], []>} : vector<8x128xbf16>, vector<128x128xbf16>, vector<8x128xf32> -> vector<8x128xf32>
    %30 = vector.extract_strided_slice %0 {offsets = [2, 0], sizes = [1, 128], strides = [1, 1]} : vector<8x128xf32> to vector<1x128xf32>
    %31 = vector.broadcast %30 : vector<1x128xf32> to vector<8x128xf32>
    %32 = arith.addf %29, %31 : vector<8x128xf32>
    %cst_17 = arith.constant 0.000000e+00 : f32
    %33 = vector.broadcast %cst_17 : f32 to vector<8x128xf32>
    %34 = arith.maximumf %32, %33 : vector<8x128xf32>
    %35 = arith.truncf %34 : vector<8x128xf32> to vector<8x128xbf16>
    %c3 = arith.constant 3 : index
    %c0_18 = arith.constant 0 : index
    %c0_19 = arith.constant 0 : index
    %36 = vector.load %arg3[%c3, %c0_18, %c0_19] : memref<6x128x128xbf16, #tpu.memory_space<vmem>>, vector<1x128x128xbf16>
    %37 = vector.shape_cast %36 : vector<1x128x128xbf16> to vector<128x128xbf16>
    %cst_20 = arith.constant dense<0.000000e+00> : vector<8x128xf32>
    %38 = tpu.matmul %35, %37, %cst_20 {dimension_numbers = #tpu.dot_dimension_numbers<[1], [0], [0], [1], [0, 0, 1, 1], [], []>} : vector<8x128xbf16>, vector<128x128xbf16>, vector<8x128xf32> -> vector<8x128xf32>
    %39 = vector.extract_strided_slice %0 {offsets = [3, 0], sizes = [1, 128], strides = [1, 1]} : vector<8x128xf32> to vector<1x128xf32>
    %40 = vector.broadcast %39 : vector<1x128xf32> to vector<8x128xf32>
    %41 = arith.addf %38, %40 : vector<8x128xf32>
    %cst_21 = arith.constant 0.000000e+00 : f32
    %42 = vector.broadcast %cst_21 : f32 to vector<8x128xf32>
    %43 = arith.maximumf %41, %42 : vector<8x128xf32>
    %44 = arith.truncf %43 : vector<8x128xf32> to vector<8x128xbf16>
    %c4 = arith.constant 4 : index
    %c0_22 = arith.constant 0 : index
    %c0_23 = arith.constant 0 : index
    %45 = vector.load %arg3[%c4, %c0_22, %c0_23] : memref<6x128x128xbf16, #tpu.memory_space<vmem>>, vector<1x128x128xbf16>
    %46 = vector.shape_cast %45 : vector<1x128x128xbf16> to vector<128x128xbf16>
    %cst_24 = arith.constant dense<0.000000e+00> : vector<8x128xf32>
    %47 = tpu.matmul %44, %46, %cst_24 {dimension_numbers = #tpu.dot_dimension_numbers<[1], [0], [0], [1], [0, 0, 1, 1], [], []>} : vector<8x128xbf16>, vector<128x128xbf16>, vector<8x128xf32> -> vector<8x128xf32>
    %48 = vector.extract_strided_slice %0 {offsets = [4, 0], sizes = [1, 128], strides = [1, 1]} : vector<8x128xf32> to vector<1x128xf32>
    %49 = vector.broadcast %48 : vector<1x128xf32> to vector<8x128xf32>
    %50 = arith.addf %47, %49 : vector<8x128xf32>
    %cst_25 = arith.constant 0.000000e+00 : f32
    %51 = vector.broadcast %cst_25 : f32 to vector<8x128xf32>
    %52 = arith.maximumf %50, %51 : vector<8x128xf32>
    %53 = arith.truncf %52 : vector<8x128xf32> to vector<8x128xbf16>
    %c5 = arith.constant 5 : index
    %c0_26 = arith.constant 0 : index
    %c0_27 = arith.constant 0 : index
    %54 = vector.load %arg3[%c5, %c0_26, %c0_27] : memref<6x128x128xbf16, #tpu.memory_space<vmem>>, vector<1x128x128xbf16>
    %55 = vector.shape_cast %54 : vector<1x128x128xbf16> to vector<128x128xbf16>
    %cst_28 = arith.constant dense<0.000000e+00> : vector<8x128xf32>
    %56 = tpu.matmul %53, %55, %cst_28 {dimension_numbers = #tpu.dot_dimension_numbers<[1], [0], [0], [1], [0, 0, 1, 1], [], []>} : vector<8x128xbf16>, vector<128x128xbf16>, vector<8x128xf32> -> vector<8x128xf32>
    %57 = vector.extract_strided_slice %0 {offsets = [5, 0], sizes = [1, 128], strides = [1, 1]} : vector<8x128xf32> to vector<1x128xf32>
    %58 = vector.broadcast %57 : vector<1x128xf32> to vector<8x128xf32>
    %59 = arith.addf %56, %58 : vector<8x128xf32>
    %60 = arith.negf %59 : vector<8x128xf32>
    %61 = math.exp %60 : vector<8x128xf32>
    %cst_29 = arith.constant 1.000000e+00 : f32
    %62 = vector.broadcast %cst_29 : f32 to vector<8x128xf32>
    %63 = arith.addf %62, %61 : vector<8x128xf32>
    %64 = arith.divf %62, %63 : vector<8x128xf32>
    %65 = vector.extract_strided_slice %64 {offsets = [0, 0], sizes = [8, 32], strides = [1, 1]} : vector<8x128xf32> to vector<8x32xf32>
    %c0_30 = arith.constant 0 : index
    %c0_31 = arith.constant 0 : index
    %66 = vector.load %arg5[%c0_30, %c0_31] : memref<8x32xf32, #tpu.memory_space<vmem>>, vector<8x32xf32>
    tpu.vector_store %arg5[%c0_30, %c0_31], %65 {strides = array<i32>} : memref<8x32xf32, #tpu.memory_space<vmem>>, vector<8x32xf32>,
    return
  }
  func.func @transform_0(%arg0: i32) -> (i32, i32) {
    %c0_i32 = arith.constant 0 : i32
    %c0_i32_0 = arith.constant 0 : i32
    return %arg0, %c0_i32 : i32, i32
  }
  func.func @transform_1(%arg0: i32) -> (i32, i32) {
    %c0_i32 = arith.constant 0 : i32
    %c0_i32_0 = arith.constant 0 : i32
    return %arg0, %c0_i32 : i32, i32
  }
  func.func @transform_2(%arg0: i32) -> (i32, i32, i32) {
    %c0_i32 = arith.constant 0 : i32
    %c0_i32_0 = arith.constant 0 : i32
    %c0_i32_1 = arith.constant 0 : i32
    %c0_i32_2 = arith.constant 0 : i32
    return %c0_i32, %c0_i32_0, %c0_i32_1 : i32, i32, i32
  }
  func.func @transform_3(%arg0: i32) -> (i32, i32) {
    %c0_i32 = arith.constant 0 : i32
    %c0_i32_0 = arith.constant 0 : i32
    %c0_i32_1 = arith.constant 0 : i32
    return %c0_i32, %c0_i32_0 : i32, i32
  }
  func.func @transform_4(%arg0: i32) -> (i32, i32) {
    %c0_i32 = arith.constant 0 : i32
    %c0_i32_0 = arith.constant 0 : i32
    return %arg0, %c0_i32 : i32, i32
  }
}

</mosaic_0001>

<bundles_post_ra>
// kernel: encoder_decoder_forward.1
= control target key start
LH: loop header
LB: loop body
LE: loop exit
PB: predicated region body
PF: predicated region fallthrough
CT: control target
= control target key end

     0   :  { %9 = vsyncpa [#allocation3], 0  ;;  %s767_s18 = smov [#allocation2]   ;;  %s768_s20 = smov 64   ;;  %s818_s0 = inlined_call_operand.vmem [shape: f32[8,16], index: 0, kind: input, shape index: {}]   ;;  %s819_s1 = inlined_call_operand.vmem [shape: f32[8,16], index: 1, kind: input, shape index: {}]   ;;  %s820_s2 = inlined_call_operand.hbm [shape: bf16[6,128,128], index: 2, kind: input, shape index: {}]   ;;  %s821_s3 = inlined_call_operand.vmem [shape: f32[8,128], index: 3, kind: input, shape index: {}]   ;;  %s822_s4 = inlined_call_operand.vmem [shape: f32[8,32], index: 4, kind: output, shape index: {}]  }
   0x1   :  { %s18_s17 = sshll.u32 %s820_s2, 4  ;;  %s20_s19 = sshll.u32 %s767_s18, 4  ;;  %s19_s17 = int_to_ptr.hbm [resolvable:$true] %s18_s17  ;;  %s21_s19 = int_to_ptr.vmem [resolvable:$true] %s20_s19 }
   0x2   :  { %s769_s21 = smov 4  }
   0x3   :  { %26 = dma.hbm_to_vmem [thread:$0]  %s19_s17, 6144, %s21_s19, [#allocation3], %s768_s20, %s768_s20, %s769_s21  }
   0x4   :  { %765 = dma.done.wait [#allocation3], 6144  }
   0x5   :  { %766 = vsyncadd [#allocation3], 4294961152  ;;  %v693_v0 = vld [vmem:[#allocation2 + $0x8] sm:$0xff]  ;;  %v692_v1 = vld [vmem:[#allocation2] sm:$0xff]  ;;  %vm49_vm0 = vcmask 130048   ;;  %vm514_vm4 = vcmask 261120  }
   0x6   :  { %v41_v2 = vld [vmem:[%s819_s1] sm:$0xff]  ;;  %v701_v5 = vld [vmem:[#allocation2 + $0x78] sm:$0xff]  ;;  %60 = vmatpush.bf16.msra.mxu0 %v693_v0  ;;  %82 = vmatpush.bf16.msra.mxu1 %v692_v1  ;;  %v700_v7 = vld [vmem:[#allocation2 + $0x70] sm:$0xff] }
   0x7   :  { %v42_v3 = vpack.c.bf16 %v41_v2, %v41_v2  ;;  %v39_v4 = vld [vmem:[%s818_s0] sm:$0xff]  ;;  %158 = vmatpush.bf16.msra.mxu2 %v701_v5  ;;  %v699_v8 = vld [vmem:[#allocation2 + $0x68] sm:$0xff]  ;;  %v697_v10 = vld [vmem:[#allocation2 + $0x58] sm:$0xff] }
   0x8   :  { %v40_v6 = vpack.c.bf16 %v39_v4, %v39_v4  ;;  %v698_v9 = vld [vmem:[#allocation2 + $0x60] sm:$0xff]  ;;  %v696_v11 = vld [vmem:[#allocation2 + $0x50] sm:$0xff]  ;;  %v695_v12 = vld [vmem:[#allocation2 + $0x48] sm:$0xff] }
   0x9   :  { %525 = vmatmul.msk.bf16.vlgmr.msra.gmra.mxu0 %vm49_vm0, %v42_v3  ;;  %v694_v13 = vld [vmem:[#allocation2 + $0x40] sm:$0xff]  ;;  %v709_v14 = vld [vmem:[#allocation2 + $0xb8] sm:$0xff]  ;;  %v708_v15 = vld [vmem:[#allocation2 + $0xb0] sm:$0xff] }
   0xa   :  { %530 = vmatmul.msk.bf16.vlgmr.msra.gmra.mxu1 %vm49_vm0, %v40_v6  ;;  %239 = vmatpush.bf16.msra.mxu3 %v709_v14  ;;  %v707_v16 = vld [vmem:[#allocation2 + $0xa8] sm:$0xff]  ;;  %v706_v17 = vld [vmem:[#allocation2 + $0xa0] sm:$0xff]  ;;  %v705_v18 = vld [vmem:[#allocation2 + $0x98] sm:$0xff] }
   0xb   :  { %159 = vmatpush.bf16.msra.mxu2 %v700_v7  ;;  %v704_v19 = vld [vmem:[#allocation2 + $0x90] sm:$0xff]  ;;  %v807_v20 = vld [vmem:[%s821_s3] sm:$0xff]  ;;  %v703_v30 = vld [vmem:[#allocation2 + $0x88] sm:$0xff] }
   0xc   :  { %v88_v21 = vperm.slane %v807_v20, 0  ;;  %v702_v31 = vld [vmem:[#allocation2 + $0x80] sm:$0xff]  ;;  %v717_v32 = vld [vmem:[#allocation2 + $0xf8] sm:$0xff]  ;;  %v716_v33 = vld [vmem:[#allocation2 + $0xf0] sm:$0xff]  ;;  %v109_v38 = vperm.slane %v807_v20, 1  ;;  %v190_v52 = vperm.slane %v807_v20, 2 }
   0xd   :  { %320 = vmatpush.bf16.msrb.mxu0 %v717_v32  ;;  %v715_v34 = vld [vmem:[#allocation2 + $0xe8] sm:$0xff]  ;;  %v714_v35 = vld [vmem:[#allocation2 + $0xe0] sm:$0xff]  ;;  %v713_v36 = vld [vmem:[#allocation2 + $0xd8] sm:$0xff]  ;;  %v271_v2 = vperm.slane %v807_v20, 3 }
   0xe   :  { %240 = vmatpush.bf16.msra.mxu3 %v708_v15  ;;  %v712_v37 = vld [vmem:[#allocation2 + $0xd0] sm:$0xff]  ;;  %v711_v44 = vld [vmem:[#allocation2 + $0xc8] sm:$0xff]  ;;  %v710_v45 = vld [vmem:[#allocation2 + $0xc0] sm:$0xff] }
   0xf   :  { %160 = vmatpush.bf16.msra.mxu2 %v699_v8  ;;  %v725_v46 = vld [vmem:[#allocation2 + $0x138] sm:$0xff]  ;;  %v724_v47 = vld [vmem:[#allocation2 + $0x130] sm:$0xff]  ;;  %v723_v48 = vld [vmem:[#allocation2 + $0x128] sm:$0xff] }
  0x10   :  { %401 = vmatpush.bf16.msrb.mxu1 %v725_v46  ;;  %v722_v49 = vld [vmem:[#allocation2 + $0x120] sm:$0xff]  ;;  %v721_v50 = vld [vmem:[#allocation2 + $0x118] sm:$0xff]  ;;  %v720_v51 = vld [vmem:[#allocation2 + $0x110] sm:$0xff] }
  0x11   :  { %321 = vmatpush.bf16.msrb.mxu0 %v716_v33  ;;  %v719_v58 = vld [vmem:[#allocation2 + $0x108] sm:$0xff]  ;;  %v718_v59 = vld [vmem:[#allocation2 + $0x100] sm:$0xff]  ;;  %v733_v60 = vld [vmem:[#allocation2 + $0x178] sm:$0xff] }
  0x12   :  { %241 = vmatpush.bf16.msra.mxu3 %v707_v16  ;;  %v732_v61 = vld [vmem:[#allocation2 + $0x170] sm:$0xff]  ;;  %v731_v62 = vld [vmem:[#allocation2 + $0x168] sm:$0xff]  ;;  %v730_v63 = vld [vmem:[#allocation2 + $0x160] sm:$0xff]  ;;  %v433_v16 = vperm.slane %v807_v20, 5 }
  0x13   :  { %161 = vmatpush.bf16.msra.mxu2 %v698_v9  ;;  %v729_v0 = vld [vmem:[#allocation2 + $0x158] sm:$0xff]  ;;  %v728_v1 = vld [vmem:[#allocation2 + $0x150] sm:$0xff]  ;;  %v727_v8 = vld [vmem:[#allocation2 + $0x148] sm:$0xff] }
  0x14   :  { %402 = vmatpush.bf16.msrb.mxu1 %v724_v47  ;;  %v726_v9 = vld [vmem:[#allocation2 + $0x140] sm:$0xff] }
  0x15   :  { %322 = vmatpush.bf16.msrb.mxu0 %v715_v34 }
  0x16   :  { %242 = vmatpush.bf16.msra.mxu3 %v706_v17 }
  0x17   :  { %162 = vmatpush.bf16.msra.mxu2 %v697_v10  ;;  %v352_v10 = vperm.slane %v807_v20, 4 }
  0x18   :  { %403 = vmatpush.bf16.msrb.mxu1 %v723_v48 }
  0x19   :  { %323 = vmatpush.bf16.msrb.mxu0 %v714_v35 }
  0x1a   :  { %243 = vmatpush.bf16.msra.mxu3 %v705_v18 }
  0x1b   :  { %163 = vmatpush.bf16.msra.mxu2 %v696_v11 }
  0x1c   :  { %404 = vmatpush.bf16.msrb.mxu1 %v722_v49 }
  0x1d   :  { %324 = vmatpush.bf16.msrb.mxu0 %v713_v36 }
  0x1e   :  { %244 = vmatpush.bf16.msra.mxu3 %v704_v19 }
  0x1f   :  { %164 = vmatpush.bf16.msra.mxu2 %v695_v12 }
  0x20   :  { %405 = vmatpush.bf16.msrb.mxu1 %v721_v50 }
  0x21   :  { %325 = vmatpush.bf16.msrb.mxu0 %v712_v37 }
  0x22   :  { %245 = vmatpush.bf16.msra.mxu3 %v703_v30 }
  0x23   :  { %165 = vmatpush.bf16.msra.mxu2 %v694_v13 }
  0x24   :  { %406 = vmatpush.bf16.msrb.mxu1 %v720_v51 }
  0x25   :  { %326 = vmatpush.bf16.msrb.mxu0 %v711_v44 }
  0x26   :  { %246 = vmatpush.bf16.msra.mxu3 %v702_v31 }
  0x27   :  { %482 = vmatpush.bf16.msrb.mxu2 %v733_v60 }
  0x28   :  { %407 = vmatpush.bf16.msrb.mxu1 %v719_v58 }
  0x29   :  { %327 = vmatpush.bf16.msrb.mxu0 %v710_v45 }
  0x2b   :  { %483 = vmatpush.bf16.msrb.mxu2 %v732_v61 }
  0x2c   :  { %408 = vmatpush.bf16.msrb.mxu1 %v718_v59 }
  0x2f   :  { %484 = vmatpush.bf16.msrb.mxu2 %v731_v62 }
  0x33   :  { %485 = vmatpush.bf16.msrb.mxu2 %v730_v63 }
  0x37   :  { %486 = vmatpush.bf16.msrb.mxu2 %v729_v0 }
  0x3b   :  { %487 = vmatpush.bf16.msrb.mxu2 %v728_v1 }
  0x3f   :  { %488 = vmatpush.bf16.msrb.mxu2 %v727_v8 }
  0x43   :  { %489 = vmatpush.bf16.msrb.mxu2 %v726_v9 }
  0x86   :  { %v62_v22 = vpop.f32.mrf.mxu0 }
  0x87   :  { %v84_v23 = vpop.f32.mrf.mxu1 }
  0x88   :  { %v85_v24 = vadd.f32 %v84_v23, %v62_v22 }
  0x8a   :  { %v89_v25 = vadd.f32 %v88_v21, %v85_v24 }
  0x8c   :  { %v90_v26 = vmax.f32 %v89_v25, 0.0 }
  0x8e   :  { %v91_v27 = vpack.c.bf16 %v90_v26, %v90_v26  ;;  %v64_v28 = vpop.f32.mrf.mxu0 }
  0x8f   :  { %v86_v29 = vpop.f32.mrf.mxu1 }
  0x90   :  { %166 = vmatmul.bf16.vlgmr.msra.gmra.mxu2 %v91_v27 }
 0x113   :  { %v167_v39 = vpop.f32.mrf.mxu2 }
 0x114   :  { %v168_v40 = vadd.f32 %v167_v39, %v109_v38 }
 0x116   :  { %v171_v41 = vmax.f32 %v168_v40, 0.0 }
 0x118   :  { %v172_v42 = vpack.c.bf16 %v171_v41, %v171_v41 }
 0x11a   :  { %247 = vmatmul.bf16.vlgmr.msra.gmra.mxu3 %v172_v42 }
 0x11b   :  { %v169_v43 = vpop.f32.mrf.mxu2 }
 0x19d   :  { %v248_v53 = vpop.f32.mrf.mxu3 }
 0x19e   :  { %v249_v54 = vadd.f32 %v248_v53, %v190_v52 }
 0x1a0   :  { %v252_v55 = vmax.f32 %v249_v54, 0.0 }
 0x1a2   :  { %v253_v56 = vpack.c.bf16 %v252_v55, %v252_v55 }
 0x1a4   :  { %328 = vmatmul.bf16.vlgmr.msrb.gmra.mxu0 %v253_v56 }
 0x1a5   :  { %v250_v57 = vpop.f32.mrf.mxu3 }
 0x221   :  { %v329_v3 = vpop.f32.mrf.mxu0 }
 0x222   :  { %v330_v4 = vadd.f32 %v329_v3, %v271_v2 }
 0x224   :  { %v333_v5 = vmax.f32 %v330_v4, 0.0 }
 0x226   :  { %v334_v6 = vpack.c.bf16 %v333_v5, %v333_v5 }
 0x228   :  { %409 = vmatmul.bf16.vlgmr.msrb.gmra.mxu1 %v334_v6 }
 0x229   :  { %v331_v7 = vpop.f32.mrf.mxu0 }
 0x2a5   :  { %v410_v11 = vpop.f32.mrf.mxu1 }
 0x2a6   :  { %v411_v12 = vadd.f32 %v410_v11, %v352_v10 }
 0x2a8   :  { %v414_v13 = vmax.f32 %v411_v12, 0.0 }
 0x2aa   :  { %v415_v14 = vpack.c.bf16 %v414_v13, %v414_v13 }
 0x2ac   :  { %490 = vmatmul.bf16.vlgmr.msrb.gmra.mxu2 %v415_v14 }
 0x2ad   :  { %v412_v15 = vpop.f32.mrf.mxu1 }
 0x32f   :  { %v491_v17 = vpop.f32.mrf.mxu2 }
 0x330   :  { %v492_v18 = vadd.f32 %v491_v17, %v433_v16 }
 0x332   :  { %v691_v19 = vmul.f32 -1.442695, %v492_v18 }
 0x334   :  { %737 = vpow2.f32 %v691_v19 }
 0x337   :  { %v493_v21 = vpop.f32.mrf.mxu2 }
 0x33a   :  { %v738_v22 = vpop.eup %737 }
 0x33b   :  { %v498_v23 = vadd.f32 1.0, %v738_v22 }
 0x33d   :  { %739 = vrcp.f32 %v498_v23  ;;  %v510_v27 = vand.u32 2147483648, %v498_v23  ;;  %v508_v29 = vand.u32 2147483647, %v498_v23  ;;  %vm504_vm2 = vweird.f32 %v498_v23 }
 0x33f   :  { %v511_v31 = vor.u32 1.1754944e-38, %v510_v27  ;;  %vm509_vm5 = vcmp.eq.f32.partialorder %v508_v29, 8.507059e+37 }
 0x343   :  { %v740_v24 = vpop.eup %739 }
 0x344   :  { %v500_v25 = vmul.f32 %v740_v24, %v498_v23  ;;  %vm505_vm1 = vweird.f32 %v740_v24 }
 0x345   :  { %vm506_vm3 = vmor %vm504_vm2, %vm505_vm1 }
 0x346   :  { %v501_v26 = vsub.f32 1.0, %v500_v25 }
 0x348   :  { %v502_v28 = vmul.f32 %v740_v24, %v501_v26 }
 0x34a   :  { %v503_v30 = vadd.f32 %v740_v24, %v502_v28 }
 0x34c   :  { %v507_v20 = vsel %vm506_vm3, %v740_v24, %v503_v30 }
 0x34d   :  { %v512_v32 = vsel %vm509_vm5, %v511_v31, %v507_v20 }
 0x34e   :  { %515 = vst.msk [vmem:[%s822_s4] sm:$0xff] %vm514_vm4, %v512_v32 }
 0x34f   :  { %520 = vsyncpa [#allocation3], 1 }

</bundles_post_ra>
